<compile_context>
chip_gen: v7x
topology: tpu7x:2x2x1
jax: 0.10.0
libtpu: 0.0.40
codegen_flags: <defaults>
</compile_context>

<pallas_src>
import numpy as np
import jax
import jax.numpy as jnp
from jax.experimental import pallas as pl
from jax.experimental.pallas import tpu as pltpu


# ----------------------------- config -----------------------------
class Config:
    block_len = 16
    num_iter_ft = 4
    num_iteration = 2
    dec_num_unit = 32
    dec_num_layer = 2        # conv layers per CNN block
    dec_kernel_size = 5      # odd; padding = k // 2 keeps the sequence length
    gru_num_layer = 2        # WrappedMinGRU(num_layers=2)


CFG = Config()


def _elu(x):
    # F.elu (alpha=1); matches the pure-JAX reference exactly.
    return jnp.where(x > 0, x, jnp.exp(jnp.minimum(x, 0.0)) - 1.0)


def _round_up(n, m):
    return ((n + m - 1) // m) * m


def _scan_strides(T):
    out, d = [], 1
    while d < T:
        out.append(d)
        d *= 2
    return out


# --------------- probe pltpu.roll direction once (semantics guard) ---------------
_ROLL_SIGN = None


def _roll_sign():
    """Returns s such that pltpu.roll(x, (s*off) % R, axis=0)[r] == x[(r + off) % R]."""
    global _ROLL_SIGN
    if _ROLL_SIGN is None:
        x = jnp.arange(8 * 128, dtype=jnp.float32).reshape(8, 128)

        def k(x_ref, o_ref):
            o_ref[...] = pltpu.roll(x_ref[...], 1, 0)

        y = pl.pallas_call(k, out_shape=jax.ShapeDtypeStruct((8, 128), jnp.float32))(x)
        if bool(jnp.array_equal(y, jnp.roll(x, 1, axis=0))):
            _ROLL_SIGN = -1
        elif bool(jnp.array_equal(y, jnp.roll(x, -1, axis=0))):
            _ROLL_SIGN = 1
        else:
            raise AssertionError("unexpected pltpu.roll semantics")
    return _ROLL_SIGN


# ----------------------------- Pallas kernel -----------------------------
def _make_turbo_kernel(*, R, T, F, H, L, G, NI, K, layout, off_col, roll_sign):
    """Fused turbo decoder forward for one batch tile of R = b_tile*T rows."""
    PAD = K // 2
    strides = _scan_strides(T)
    bf16, f32 = jnp.bfloat16, jnp.float32

    def kernel(base_ref, perms_ref, masks_ref, wslab_ref, bslab_ref, out_ref):

        def dot(a, w):
            # MXU bf16 x bf16 -> f32 accumulate.
            return jnp.dot(a.astype(bf16), w.astype(bf16),
                           preferred_element_type=f32)

        def read_w(e):          # e = (row, nrows, ncols) into the bf16 weight slab
            r0, nr, nc = e
            return wslab_ref[r0:r0 + nr, 0:nc]

        def read_b(e):          # bias slab is f32
            r0, _, nc = e
            return bslab_ref[r0:r0 + 1, 0:nc]

        # ---- hoisted constants: loaded / derived exactly once per grid step ----
        p_int = perms_ref[0]                                    # (R,R) bf16, 0/1
        p_deint = perms_ref[1]
        masks = masks_ref[...]                                  # (R, n_off) f32
        mask = {o: masks[:, c:c + 1] for o, c in off_col.items()}
        fill = {d: 1.0 - mask[-d] for d in strides}             # scan identity fill

        def time_shift(x, off):
            # out[r] = x[r + off] if (r%T)+off stays inside the sequence, else 0.
            # Roll is cyclic over the whole (R, C) tile; the precomputed mask zeroes
            # every row whose source crossed a sequence boundary (incl. wrap-around).
            s = (roll_sign * off) % R
            return pltpu.roll(x, s, 0) * mask[off]

        def conv_first(base_sh, prior, dp):
            # Conv1d(k=K, pad=K//2), layer 0; input = [sys|par](2) ++ prior(F).
            # Weight is split per-tap into [sys|par] and prior groups so no in-kernel
            # feature concatenation is needed; shifts are on the narrow inputs.
            acc = None
            for j in range(K):
                pj = prior if j == PAD else time_shift(prior, j - PAD)
                t = dot(base_sh[j], read_w(dp["c0_sp"][j])) \
                    + dot(pj, read_w(dp["c0_pr"][j]))
                acc = t if acc is None else acc + t
            return _elu(acc + read_b(dp["c0_b"]))

        def conv_rest(x, taps, b_entry):
            acc = None
            for j in range(K):
                xj = x if j == PAD else time_shift(x, j - PAD)
                t = dot(xj, read_w(taps[j]))
                acc = t if acc is None else acc + t
            return _elu(acc + read_b(b_entry))

        def mingru(x, w_entry, b_entry):
            # TODO(synk): WrappedMinGRU source unavailable; standard minGRU assumed.
            zh = dot(x, read_w(w_entry)) + read_b(b_entry)      # fused (Din, 2H)
            z = jax.nn.sigmoid(zh[:, :H])
            coef = 1.0 - z                    # a_t
            acc = z * zh[:, H:]               # b_t ; h_t = a_t*h_{t-1} + b_t, h_0 = 0
            # Hillis-Steele linear scan over time, ceil(log2(T)) steps; shifts are
            # sublane rolls + masks (XLU/VPU), combine stays f32 on the VPU.
            for d in strides:
                coef_prev = time_shift(coef, -d) + fill[d]
                acc_prev = time_shift(acc, -d)
                acc = coef * acc_prev + acc
                coef = coef * coef_prev
            return acc

        def half_step(base_sh, prior, dp, gp):
            x = conv_first(base_sh, prior, dp)
            for l in range(1, L):
                x = conv_rest(x, dp["c"][l - 1], dp["cb"][l - 1])
            for g in range(G):
                x = mingru(x, gp["gru"][g][0], gp["gru"][g][1])
            return dot(x, read_w(dp["wo"])) + read_b(dp["bo"])

        def permute(p, x):
            # block-diagonal (de)interleave as a permutation matmul (exact in bf16)
            return jnp.dot(p, x.astype(bf16), preferred_element_type=f32)

        dec1, dec2 = layout[:NI], layout[NI:]

        base = base_ref[...]                                    # (R, 4) f32
        b1, b2 = base[:, 0:2], base[:, 2:4]
        # channel-feature shifts hoisted: reused by every dec1 / dec2 conv0 call
        base1_sh = [b1 if j == PAD else time_shift(b1, j - PAD) for j in range(K)]
        base2_sh = [b2 if j == PAD else time_shift(b2, j - PAD) for j in range(K)]

        # ---- full turbo schedule, unrolled, everything VMEM/vreg resident ----
        prior = jnp.zeros((R, F), f32)
        for idx in range(NI - 1):
            x_plr = half_step(base1_sh, prior, dec1[idx], dec1[idx])
            x_plr_int = permute(p_int, x_plr - prior)
            x_plr2 = half_step(base2_sh, x_plr_int, dec2[idx], dec2[idx])
            prior = permute(p_deint, x_plr2 - x_plr_int)

        # Final iteration: the reference forward reuses grus[num_iteration - 2]
        # (leaked loop variable) while cnns/outputs use index -1 -> replicate.
        g_idx = NI - 2 if NI >= 2 else 0
        x_plr = half_step(base1_sh, prior, dec1[NI - 1], dec1[g_idx])
        x_plr_int = permute(p_int, x_plr - prior)
        x_plr2 = half_step(base2_sh, x_plr_int, dec2[NI - 1], dec2[g_idx])

        out_ref[...] = jax.nn.sigmoid(permute(p_deint, x_plr2)).astype(out_ref.dtype)

    return kernel


# ----------------------------- host-side packing -----------------------------
class _Packer:
    """Packs many small 2-D weights into one (rows, width) slab, 8-row aligned each."""

    def __init__(self, width):
        self.width = width
        self.row = 0
        self.items = []

    def add(self, arr):
        arr = np.asarray(arr, np.float32)
        if arr.ndim == 1:
            arr = arr[None, :]
        assert arr.ndim == 2 and arr.shape[1] <= self.width
        r0 = self.row
        self.items.append((r0, arr))
        self.row = r0 + _round_up(arr.shape[0], 8)
        return (r0, int(arr.shape[0]), int(arr.shape[1]))

    def build(self, dtype):
        rows = max(_round_up(self.row, 8), 8)
        slab = np.zeros((rows, self.width), np.float32)
        for r0, a in self.items:
            slab[r0:r0 + a.shape[0], :a.shape[1]] = a
        return jnp.asarray(slab, dtype)


def _choose_b_tile(bs, T):
    # Target R = b_tile*T around 256 rows (fills MXU M dim), but keep >= 2 grid steps
    # when bs allows so the "parallel" batch axis can shard across v7x's 2 TensorCores.
    bt = max(1, min(bs, 256 // max(T, 1)))
    if bs >= 2 and bs // bt < 2:
        bt = bs // 2
    bt = max(bt, 1)
    while bt > 1 and bs % bt:
        bt -= 1
    return bt


# ----------------------------- wrapper -----------------------------
def turbo_decode_pallas(received, params, perm, inv_perm, cfg=CFG, b_tile=None):
    bs = received.shape[0]
    T, F, H = cfg.block_len, cfg.num_iter_ft, cfg.dec_num_unit
    L, G = cfg.dec_num_layer, cfg.gru_num_layer
    NI, K = cfg.num_iteration, cfg.dec_kernel_size
    PAD = K // 2
    if b_tile is None:
        b_tile = _choose_b_tile(bs, T)
    assert bs % b_tile == 0
    R = b_tile * T

    # channel features; base1=[sys|par_deint] (dec1 half-steps), base2=[sys_int|par]
    # (dec2 half-steps), merged into one (R,4) input.
    x = received.reshape(bs, T, 2).astype(jnp.float32)
    r_sys, r_par = x[:, :, 0:1], x[:, :, 1:2]
    base = jnp.concatenate(
        [r_sys, r_par[:, inv_perm, :], r_sys[:, perm, :], r_par], axis=-1
    ).reshape(bs * T, 4)

    # precomputed per-row boundary masks for every time-shift offset used in-kernel
    offs = sorted({j - PAD for j in range(K) if j != PAD}
                  | {-d for d in _scan_strides(T)})
    t_of_r = np.arange(R) % T
    masks = jnp.asarray(np.stack(
        [((t_of_r + o >= 0) & (t_of_r + o < T)).astype(np.float32) for o in offs],
        axis=1))                                              # (R, n_off)
    off_col = {o: i for i, o in enumerate(offs)}

    # block-diagonal (de)interleave permutation matrices; 0/1 so exact in bf16
    eye_b = np.eye(b_tile, dtype=np.float32)
    p_int = np.kron(eye_b, np.asarray(jax.nn.one_hot(perm, T, dtype=jnp.float32)))
    p_deint = np.kron(eye_b, np.asarray(jax.nn.one_hot(inv_perm, T, dtype=jnp.float32)))
    perms = jnp.asarray(np.stack([p_int, p_deint], 0), jnp.bfloat16)

    # pack all matmul weights into one bf16 slab and all biases into one f32 slab;
    # dec1[0..NI-1] then dec2[0..NI-1]; conv layer 0 split into [sys|par] / prior taps.
    wp, bp = _Packer(2 * H), _Packer(2 * H)
    layout = []
    for bank in (params["dec1"], params["dec2"]):
        for dec in bank:
            e = {}
            w0 = np.asarray(dec["cnn"][0]["w"])               # (K, 2+F, H)
            e["c0_sp"] = [wp.add(w0[j, :2, :]) for j in range(K)]
            e["c0_pr"] = [wp.add(w0[j, 2:, :]) for j in range(K)]
            e["c0_b"] = bp.add(dec["cnn"][0]["b"])
            e["c"], e["cb"] = [], []
            for l in range(1, L):
                wl = np.asarray(dec["cnn"][l]["w"])           # (K, H, H)
                e["c"].append([wp.add(wl[j]) for j in range(K)])
                e["cb"].append(bp.add(dec["cnn"][l]["b"]))
            e["gru"] = [(wp.add(g["wzh"]), bp.add(g["bzh"])) for g in dec["gru"]]
            e["wo"] = wp.add(dec["wo"])
            e["bo"] = bp.add(dec["bo"])
            layout.append(e)
    wslab = wp.build(jnp.bfloat16)
    bslab = bp.build(jnp.float32)

    def _const_spec(a):
        nd = a.ndim
        return pl.BlockSpec(tuple(a.shape), lambda g, _nd=nd: (0,) * _nd)

    kernel = _make_turbo_kernel(
        R=R, T=T, F=F, H=H, L=L, G=G, NI=NI, K=K,
        layout=layout, off_col=off_col, roll_sign=_roll_sign())

    out = pl.pallas_call(
        kernel,
        out_shape=jax.ShapeDtypeStruct((bs * T, 1), jnp.float32),
        grid_spec=pltpu.PrefetchScalarGridSpec(
            num_scalar_prefetch=0,
            grid=(bs // b_tile,),
            in_specs=[
                pl.BlockSpec((R, 4), lambda g: (g, 0)),
                _const_spec(perms),
                _const_spec(masks),
                _const_spec(wslab),
                _const_spec(bslab),
            ],
            out_specs=pl.BlockSpec((R, 1), lambda g: (g, 0)),
        ),
        compiler_params=pltpu.CompilerParams(dimension_semantics=("parallel",)),
    )(base, perms, masks, wslab, bslab)

    return out.reshape(bs, T)


# ----------------------------- parameter init -----------------------------
def _uniform(key, shape, bound):
    return jax.random.uniform(key, shape, jnp.float32, -bound, bound)


def make_decoder_params(key, cfg, out_size):
    K, H, L, G = cfg.dec_kernel_size, cfg.dec_num_unit, cfg.dec_num_layer, cfg.gru_num_layer
    keys = list(jax.random.split(key, 2 * L + 2 * G + 2))
    cnn, cin = [], 2 + cfg.num_iter_ft
    for _ in range(L):
        bound = 1.0 / float(np.sqrt(cin * K))
        cnn.append({"w": _uniform(keys.pop(), (K, cin, H), bound),
                    "b": _uniform(keys.pop(), (1, H), bound)})
        cin = H
    gru, din = [], H
    for _ in range(G):
        bound = 1.0 / float(np.sqrt(din))
        gru.append({"wzh": _uniform(keys.pop(), (din, 2 * H), bound),
                    "bzh": _uniform(keys.pop(), (1, 2 * H), bound)})
        din = H
    bound = 1.0 / float(np.sqrt(H))
    wo = _uniform(keys.pop(), (H, out_size), bound)
    bo = _uniform(keys.pop(), (1, out_size), bound)
    return {"cnn": cnn, "gru": gru, "wo": wo, "bo": bo}


def make_all_params(key, cfg=CFG):
    params = {"dec1": [], "dec2": []}
    for idx in range(cfg.num_iteration):
        key, k1, k2 = jax.random.split(key, 3)
        out1 = cfg.num_iter_ft
        out2 = 1 if idx == cfg.num_iteration - 1 else cfg.num_iter_ft
        params["dec1"].append(make_decoder_params(k1, cfg, out1))
        params["dec2"].append(make_decoder_params(k2, cfg, out2))
    return params


# ----------------------------- pure-JAX reference -----------------------------
HI = jax.lax.Precision.HIGHEST


def _ref_conv(x, w, b):
    K, pad, T = w.shape[0], w.shape[0] // 2, x.shape[1]
    xp = jnp.pad(x, ((0, 0), (pad, pad), (0, 0)))
    acc = 0.0
    for j in range(K):
        acc = acc + jnp.einsum("btc,co->bto", xp[:, j:j + T, :], w[j], precision=HI)
    return _elu(acc + b[None])


def _ref_mingru(x, wzh, bzh):
    zh = jnp.einsum("btd,dk->btk", x, wzh, precision=HI) + bzh[None]
    H = wzh.shape[1] // 2
    z, hc = jax.nn.sigmoid(zh[..., :H]), zh[..., H:]
    h = jnp.zeros((x.shape[0], H), jnp.float32)
    hs = []
    for t in range(x.shape[1]):
        h = (1.0 - z[:, t]) * h + z[:, t] * hc[:, t]
        hs.append(h)
    return jnp.stack(hs, axis=1)


def _ref_half_step(base, prior, d_cnn_out, d_gru):
    x = jnp.concatenate([base, prior], axis=-1)
    for cl in d_cnn_out["cnn"]:
        x = _ref_conv(x, cl["w"], cl["b"])
    for gl in d_gru["gru"]:
        x = _ref_mingru(x, gl["wzh"], gl["bzh"])
    return jnp.einsum("bth,ho->bto", x, d_cnn_out["wo"], precision=HI) + d_cnn_out["bo"][None]


def ref_forward(received, params, perm, inv_perm, cfg=CFG):
    bs = received.shape[0]
    x = received.reshape(bs, cfg.block_len, 2).astype(jnp.float32)
    r_sys, r_par = x[:, :, 0:1], x[:, :, 1:2]
    base1 = jnp.concatenate([r_sys, r_par[:, inv_perm, :]], axis=-1)
    base2 = jnp.concatenate([r_sys[:, perm, :], r_par], axis=-1)
    prior = jnp.zeros((bs, cfg.block_len, cfg.num_iter_ft), jnp.float32)
    dec1, dec2, NI = params["dec1"], params["dec2"], cfg.num_iteration
    for idx in range(NI - 1):
        x_plr = _ref_half_step(base1, prior, dec1[idx], dec1[idx])
        x_plr_int = (x_plr - prior)[:, perm, :]
        x_plr2 = _ref_half_step(base2, x_plr_int, dec2[idx], dec2[idx])
        prior = (x_plr2 - x_plr_int)[:, inv_perm, :]
    g_idx = NI - 2 if NI >= 2 else 0
    x_plr = _ref_half_step(base1, prior, dec1[NI - 1], dec1[g_idx])
    x_plr_int = (x_plr - prior)[:, perm, :]
    x_plr2 = _ref_half_step(base2, x_plr_int, dec2[NI - 1], dec2[g_idx])
    return jax.nn.sigmoid(x_plr2[:, inv_perm, :])[:, :, 0]


# ----------------------------- main -----------------------------
if __name__ == "__main__":
    root = jax.random.PRNGKey(0)
    k_params, k_perm, k_data = jax.random.split(root, 3)

    params = make_all_params(k_params)

    perm = jax.random.permutation(k_perm, CFG.block_len)
    inv_perm = jnp.argsort(perm)

    bs = 8                       # b_tile=4 -> R=64 rows/tile, grid=(2,)
    received = jax.random.normal(k_data, (bs, CFG.block_len * 2), jnp.float32)

    out = turbo_decode_pallas(received, params, perm, inv_perm)
    out = jax.block_until_ready(out)

    assert out.shape == (bs, CFG.block_len), out.shape
    assert bool(jnp.all(jnp.isfinite(out)))

    ref = ref_forward(received, params, perm, inv_perm)
    err = float(jnp.max(jnp.abs(out - ref)))
    # bf16 MXU operands vs f32 HIGHEST-precision reference
    assert err < 3e-2, f"mismatch vs pure-JAX reference: max abs err = {err}"

    print("KERNEL_OK")
</pallas_src>

<mosaic_0001>
module attributes {stable_mosaic.version = 11 : i64} {
  func.func @k(%arg0: memref<8x128xf32, #tpu.memory_space<vmem>>, %arg1: memref<8x128xf32, #tpu.memory_space<vmem>>) attributes {dimension_semantics = [], scalar_prefetch = 0 : i64, scratch_operands = 0 : i64, tpu.core_type = #tpu.core_type<tc>} {
    %c0 = arith.constant 0 : index
    %c0_0 = arith.constant 0 : index
    %0 = vector.load %arg0[%c0, %c0_0] : memref<8x128xf32, #tpu.memory_space<vmem>>, vector<8x128xf32>
    %c1_i32 = arith.constant 1 : i32
    %1 = tpu.dynamic_rotate %0 by %c1_i32 dim 0 : vector<8x128xf32>, i32 -> vector<8x128xf32>
    %c0_1 = arith.constant 0 : index
    %c0_2 = arith.constant 0 : index
    %2 = vector.load %arg1[%c0_1, %c0_2] : memref<8x128xf32, #tpu.memory_space<vmem>>, vector<8x128xf32>
    tpu.vector_store %arg1[%c0_1, %c0_2], %1 {strides = array<i32>} : memref<8x128xf32, #tpu.memory_space<vmem>>, vector<8x128xf32>,
    return
  }
}

</mosaic_0001>

<bundles_post_ra>
// kernel: tpu_custom_call.1
= control target key start
LH: loop header
LB: loop body
LE: loop exit
PB: predicated region body
PF: predicated region fallthrough
CT: control target
= control target key end

     0   :  { %6 = vsyncpa [#allocation3], 0  ;;  %s125_s0 = inlined_call_operand.hbm [shape: f32[8,128], index: 0, kind: input, shape index: {}]   ;;  %s126_s1 = inlined_call_operand.hbm [shape: f32[8,128], index: 1, kind: output, shape index: {}]  }
   0x1   :  { %7 = vsyncpa [#allocation4], 0  ;;  %s89_s6 = smov [#allocation2]   ;;  %s41_s10 = scalar_lea.hbm %s125_s0, 128 }
   0x2   :  { %s14_s7 = sshll.u32 %s89_s6, 4  ;;  %p42_p0 = scmp.ne.s32.totalorder %s125_s0, %s41_s10  ;;  %s15_s7 = int_to_ptr.vmem [resolvable:$true] %s14_s7 }
   0x3   :  { %p45_p1 = scmp.lt.u32.totalorder %s41_s10, %s125_s0 }
   0x5   :  { %p47_p2 = pnand %p45_p1, %p42_p0 }
   0x7   :  { %50 = shalt.err (!%p47_p2)
}
   0x8   :  { %s51_s15 = scalar_lea.vmem %s15_s7, 128  ;;  %p56_p4 = scmp.lt.s32.totalorder %s15_s7, %s15_s7 }
   0x9   :  { %p52_p3 = scmp.ne.s32.totalorder %s15_s7, %s51_s15  ;;  %p57_p5 = scmp.lt.s32.totalorder %s51_s15, %s51_s15 }
   0xb   :  { %p58_p6 = por %p57_p5, %p56_p4 }
   0xd   :  { %p59_p7 = pnand %p58_p6, %p52_p3 }
   0xf   :  { %62 = shalt.err (!%p59_p7)
}
  0x10   :  { %17 = dma.hbm_to_vmem [thread:$0]  %s125_s0, 128, %s15_s7, [#allocation3]  }
  0x11   :  { %85 = dma.done.wait [#allocation3], 128  }
  0x12   :  { %86 = vsyncadd [#allocation3], 4294967168  ;;  %s90_s18 = smov [#allocation5]   ;;  %v21_v0 = vld [vmem:[#allocation2] sm:$0xff] }
  0x13   :  { %s30_s19 = sshll.u32 %s90_s18, 4  ;;  %v22_v1 = vrot.slane %v21_v0, 7  ;;  %s31_s19 = int_to_ptr.vmem [resolvable:$true] %s30_s19 }
  0x14   :  { %s63_s20 = scalar_lea.vmem %s31_s19, 128  ;;  %p68_p9 = scmp.lt.s32.totalorder %s31_s19, %s31_s19 }
  0x15   :  { %23 = vst [vmem:[#allocation5] sm:$0xff] %v22_v1  ;;  %p64_p8 = scmp.ne.s32.totalorder %s31_s19, %s63_s20  ;;  %p69_p10 = scmp.lt.s32.totalorder %s63_s20, %s63_s20 }
  0x17   :  { %p70_p11 = por %p69_p10, %p68_p9 }
  0x19   :  { %p71_p12 = pnand %p70_p11, %p64_p8 }
  0x1b   :  { %74 = shalt.err (!%p71_p12)
}
  0x1c   :  { %s75_s23 = scalar_lea.hbm %s126_s1, 128 }
  0x1d   :  { %p76_p13 = scmp.ne.s32.totalorder %s126_s1, %s75_s23  ;;  %p79_p0 = scmp.lt.u32.totalorder %s75_s23, %s126_s1 }
  0x1f   :  { %p81_p1 = pnand %p79_p0, %p76_p13 }
  0x21   :  { %84 = shalt.err (!%p81_p1)
}
  0x22   :  { %33 = dma.vmem_to_hbm [thread:$0]  %s31_s19, 128, %s126_s1, [#allocation4]  }
  0x23   :  { %87 = dma.done.wait [#allocation4], 128  }
  0x24   :  { %88 = vsyncadd [#allocation4], 4294967168 }
  0x25   :  { %37 = vsyncpa [#allocation3], 1 }
  0x26   :  { %38 = vsyncpa [#allocation4], 1 }

</bundles_post_ra>
